<compile_context>
chip_gen: v7x
topology: tpu7x:2x2x1
jax: 0.10.0
libtpu: 0.0.40
codegen_flags: <defaults>
</compile_context>

<pallas_src>
import functools

import jax
import jax.numpy as jnp
from jax.experimental import pallas as pl
from jax.experimental.pallas import tpu as pltpu

IGNORE_INDEX = 255


def _ce_kernel(logits_ref, labels_ref, *rest, hw, tp, t_inner, mode):
    """One grid step: a (C, TP) logits tile of one batch element.

    mode 0 (no weights):        rest = (loss_out, wsum_out, loss_acc, w_acc)
    mode 1 (per-class (C,1)):   rest = (w_ref,  loss_out, wsum_out, loss_acc, w_acc)
    mode 2 (per-pixel (1,TP)):  rest = (pw_ref, loss_out, wsum_out, loss_acc, w_acc)
    """
    if mode == 0:
        loss_out_ref, wsum_out_ref, loss_acc, w_acc = rest
        aux_ref = None
    else:
        aux_ref, loss_out_ref, wsum_out_ref, loss_acc, w_acc = rest

    s = pl.program_id(1)   # pixel super-block (parallel)
    t = pl.program_id(2)   # pixel tile within super-block (arbitrary)

    @pl.when(t == 0)
    def _():
        loss_acc[...] = jnp.zeros_like(loss_acc)
        w_acc[...] = jnp.zeros_like(w_acc)

    logits = logits_ref[...].astype(jnp.float32)            # (C, TP)
    labels = labels_ref[...].astype(jnp.int32)               # (1, TP)
    n_classes = logits.shape[0]

    # Numerically stable logsumexp over the class (sublane) axis.
    m = jnp.max(logits, axis=0, keepdims=True)                # (1, TP)
    lse = jnp.log(jnp.sum(jnp.exp(logits - m), axis=0, keepdims=True))

    # Gather the label logit via one-hot (no dynamic lane gather on TPU).
    class_ids = jax.lax.broadcasted_iota(jnp.int32, logits.shape, 0)
    onehot = (class_ids == labels).astype(jnp.float32)        # (C, TP)
    px_logit = jnp.sum(onehot * logits, axis=0, keepdims=True)
    nll = (m + lse) - px_logit                                 # (1, TP)

    valid = labels != IGNORE_INDEX                             # (1, TP)
    if hw % tp != 0:
        # Ragged tail: mask lanes past the real pixel count.  The padded block
        # contents are garbage, so exp/max above may produce Inf/NaN -- the
        # final select (below) must stay AFTER that math.
        col = jax.lax.broadcasted_iota(jnp.int32, labels.shape, 1)
        valid = jnp.logical_and(valid, (s * t_inner + t) * tp + col < hw)

    if mode == 0:
        # Fast path: weight 1 for every valid, in-range label.
        in_range = jnp.logical_and(labels >= 0, labels < n_classes)
        px_w = jnp.where(jnp.logical_and(valid, in_range),
                         jnp.float32(1.0), jnp.float32(0.0))
    elif mode == 1:
        w = aux_ref[...].astype(jnp.float32)                   # (C, 1)
        px_w = jnp.where(valid, jnp.sum(onehot * w, axis=0, keepdims=True), 0.0)
    else:
        px_w = jnp.where(valid, aux_ref[...].astype(jnp.float32), 0.0)

    # Keep this where() AFTER the (possibly NaN) px_w * nll product.
    loss_acc[...] += jnp.where(valid, px_w * nll, 0.0)
    w_acc[...] += px_w

    @pl.when(t == pl.num_programs(2) - 1)
    def _():
        loss_out_ref[...] = jnp.full((1, 1, 8, 128), jnp.sum(loss_acc[...]),
                                     dtype=jnp.float32)
        wsum_out_ref[...] = jnp.full((1, 1, 8, 128), jnp.sum(w_acc[...]),
                                     dtype=jnp.float32)


def _round_up(x, m):
    return ((x + m - 1) // m) * m


def _vmem_capacity_bytes():
    """Physical VMEM per TensorCore; falls back to 128 MiB (v5e/v6e)."""
    try:
        info = pltpu.get_tpu_info()
        cap = getattr(info, "vmem_capacity_bytes", None)
        if cap:
            return int(cap)
    except Exception:
        pass
    return 128 * 1024 * 1024


def _choose_tile(hw, c, logit_itemsize, lab_itemsize, pw_itemsize, budget):
    """Largest lane-aligned pixel tile whose full VMEM footprint fits budget."""
    per_lane = (2 * c * logit_itemsize        # double-buffered logits tile
                + 2 * lab_itemsize            # double-buffered labels tile
                + 2 * pw_itemsize             # double-buffered per-pixel weights
                + 6 * max(c, 8) * 4           # live f32 (C,TP) temporaries (sublane-padded)
                + 10 * 8 * 4)                 # (1,TP) f32 rows + accumulators (sublane-padded)
    tp = budget // max(per_lane, 1)
    tp = min(tp, 64 * 1024, _round_up(hw, 128))
    return max(128, (tp // 128) * 128)


@functools.partial(
    jax.jit,
    static_argnames=("tp", "s_blocks", "t_inner", "mode", "vmem_limit"))
def _ce_pallas(logits_ncp, labels_n1p, aux, *, tp, s_blocks, t_inner, mode,
               vmem_limit):
    N, C, HW = logits_ncp.shape
    grid = (N, s_blocks, t_inner)
    kernel = functools.partial(_ce_kernel, hw=HW, tp=tp, t_inner=t_inner,
                               mode=mode)

    def px_map(n, s, t):
        return (n, 0, s * t_inner + t)

    in_specs = [
        pl.BlockSpec((pl.Squeezed(), C, tp), px_map),   # logits tile (C, TP)
        pl.BlockSpec((pl.Squeezed(), 1, tp), px_map),   # labels tile (1, TP)
    ]
    operands = [logits_ncp, labels_n1p]
    bytes_accessed = (N * C * HW * logits_ncp.dtype.itemsize
                      + N * HW * labels_n1p.dtype.itemsize
                      + 2 * N * s_blocks * 8 * 128 * 4)
    if mode == 1:
        in_specs.append(pl.BlockSpec((C, 1), lambda n, s, t: (0, 0)))
        operands.append(aux)
        bytes_accessed += C * 4
    elif mode == 2:
        in_specs.append(pl.BlockSpec((pl.Squeezed(), 1, tp), px_map))
        operands.append(aux)
        bytes_accessed += N * HW * 4

    out_specs = [
        pl.BlockSpec((1, 1, 8, 128), lambda n, s, t: (n, s, 0, 0)),
        pl.BlockSpec((1, 1, 8, 128), lambda n, s, t: (n, s, 0, 0)),
    ]

    loss_parts, w_parts = pl.pallas_call(
        kernel,
        out_shape=(
            jax.ShapeDtypeStruct((N, s_blocks, 8, 128), jnp.float32),
            jax.ShapeDtypeStruct((N, s_blocks, 8, 128), jnp.float32),
        ),
        grid_spec=pltpu.PrefetchScalarGridSpec(
            num_scalar_prefetch=0,
            grid=grid,
            in_specs=in_specs,
            out_specs=out_specs,
            scratch_shapes=[
                pltpu.VMEM((1, tp), jnp.float32),   # per-lane loss accumulator
                pltpu.VMEM((1, tp), jnp.float32),   # per-lane weight accumulator
            ],
        ),
        compiler_params=pltpu.CompilerParams(
            dimension_semantics=("parallel", "parallel", "arbitrary"),
            vmem_limit_bytes=vmem_limit),
        cost_estimate=pl.CostEstimate(
            flops=6 * N * C * HW,
            transcendentals=N * C * HW + N * HW,
            bytes_accessed=bytes_accessed),
    )(*operands)

    # Final reduction over (batch, super-block) partials + normalization.
    return jnp.sum(loss_parts[:, :, 0, 0]) / jnp.sum(w_parts[:, :, 0, 0])


def cross_entropy_loss(prediction, label, weights=None, tile_pixels=None):
    """JAX/Pallas equivalent of CrossEntropyLoss.forward.

    prediction: (N, C, H, W) float logits (NCHW, like PyTorch)
    label:      (N, H, W)    integer class ids (255 = ignore)
    """
    N, C, H, W = prediction.shape
    HW = H * W

    # Free reshapes (no HBM transpose / pad / cast of the logits):
    logits_ncp = prediction.reshape(N, C, HW)
    # int16 labels halve label HBM traffic; 255 (ignore) stays representable.
    labels_n1p = label.astype(jnp.int16).reshape(N, 1, HW)

    if weights is None:
        mode, aux, pw_bytes = 0, None, 0
    elif C >= 8:
        # Gather per-pixel weights once in plain XLA; stream (1, TP) f32 tiles
        # instead of doing the (C, TP) onehot*w reduce in-kernel.
        mode, pw_bytes = 2, 4
        w = jnp.asarray(weights, dtype=jnp.float32).reshape(C)
        lbl = label.astype(jnp.int32)
        in_range = jnp.logical_and(lbl >= 0, lbl < C)
        aux = jnp.where(in_range, w[jnp.clip(lbl, 0, C - 1)], 0.0)
        aux = aux.reshape(N, 1, HW).astype(jnp.float32)
    else:
        # Small C: the in-kernel onehot*w reduce is cheaper than +4 B/px DMA.
        mode, pw_bytes = 1, 0
        aux = jnp.asarray(weights, dtype=jnp.float32).reshape(C, 1)

    cap = _vmem_capacity_bytes()
    # Generation-aware tile budget (v7x: 64 MiB/TC vs 128 MiB on v5e/v6e);
    # leave headroom for Mosaic scratch and the small output buffers.
    budget = min(int(cap * 0.6), 80 * 1024 * 1024)
    vmem_limit = max(32 * 1024 * 1024, int(min(cap, 128 * 1024 * 1024) * 0.9))

    if tile_pixels is None:
        tp = _choose_tile(HW, C, prediction.dtype.itemsize,
                          labels_n1p.dtype.itemsize, pw_bytes, budget)
    else:
        tp = int(tile_pixels)

    total_tiles = -(-HW // tp)
    # Second *parallel* axis over pixel super-blocks so v7x's second
    # TensorCore is busy even at N == 1.  Only split when it divides evenly
    # (no phantom tiles); harmless on single-TC v5e/v6e.
    if N == 1 and total_tiles >= 2 and total_tiles % 2 == 0:
        s_blocks = 2
    else:
        s_blocks = 1
    t_inner = total_tiles // s_blocks

    return _ce_pallas(logits_ncp, labels_n1p, aux, tp=tp, s_blocks=s_blocks,
                      t_inner=t_inner, mode=mode, vmem_limit=vmem_limit)


class CrossEntropyLoss:
    """Mirror of the PyTorch nn.Module (weights optional, ignore_index=255)."""

    def __init__(self, weights=None):
        self.weights = None if weights is None else jnp.asarray(weights, jnp.float32)

    def __call__(self, prediction, label):
        return cross_entropy_loss(prediction, label, self.weights)

    forward = __call__


def _reference_loss(prediction, label, weights=None):
    """Pure-JAX reference of the same semantics (sanity check)."""
    N, C, H, W = prediction.shape
    lbl = label.astype(jnp.int32).reshape(-1)
    w = (jnp.ones((C,), jnp.float32) if weights is None
         else jnp.asarray(weights, jnp.float32))
    logits = jnp.transpose(prediction, (0, 2, 3, 1)).reshape(-1, C).astype(jnp.float32)
    logp = jax.nn.log_softmax(logits, axis=-1)
    valid = lbl != IGNORE_INDEX
    safe = jnp.where(valid, lbl, 0)
    nll = -jnp.take_along_axis(logp, safe[:, None], axis=-1)[:, 0]
    pw = jnp.where(valid, w[safe], 0.0)
    return jnp.sum(pw * nll) / jnp.sum(pw)


if __name__ == "__main__":
    key = jax.random.PRNGKey(0)
    keys = jax.random.split(key, 9)

    # Case 1: no weights (mode 0 fast path), HW multiple of 128, single tile.
    N, C, H, W = 2, 4, 16, 16
    prediction = jax.random.normal(keys[0], (N, C, H, W), dtype=jnp.float32)
    label = jax.random.randint(keys[1], (N, H, W), 0, C, dtype=jnp.int32)
    label = jnp.where(jax.random.bernoulli(keys[2], 0.1, (N, H, W)),
                      IGNORE_INDEX, label)
    loss = jax.block_until_ready(CrossEntropyLoss()(prediction, label))
    ref = _reference_loss(prediction, label)
    assert jnp.allclose(loss, ref, atol=1e-5, rtol=1e-5), (loss, ref)

    # Case 2: per-class weights, small C (mode 1, in-kernel onehot*w), ragged
    # pixel count (H*W = 400), forced TP=128 -> 4 tiles, last tile 16 lanes.
    H2, W2 = 20, 20
    prediction2 = jax.random.normal(keys[3], (N, C, H2, W2), dtype=jnp.float32)
    label2 = jax.random.randint(keys[4], (N, H2, W2), 0, C, dtype=jnp.int32)
    label2 = jnp.where(jax.random.bernoulli(keys[5], 0.15, (N, H2, W2)),
                       IGNORE_INDEX, label2)
    wts = [0.25, 1.0, 2.0, 0.5]
    loss2 = jax.block_until_ready(
        cross_entropy_loss(prediction2, label2, weights=wts, tile_pixels=128))
    ref2 = _reference_loss(prediction2, label2, weights=wts)
    assert jnp.allclose(loss2, ref2, atol=1e-5, rtol=1e-5), (loss2, ref2)

    # Case 2b: same inputs, auto tile size through the module API.
    loss2b = jax.block_until_ready(CrossEntropyLoss(wts)(prediction2, label2))
    assert jnp.allclose(loss2b, ref2, atol=1e-5, rtol=1e-5), (loss2b, ref2)

    # Case 3: N=1, C=8 -> wrapper-side per-pixel weight gather (mode 2),
    # 2 pixel super-blocks (second parallel axis), ragged last tile (HW=960).
    N3, C3, H3, W3 = 1, 8, 30, 32
    prediction3 = jax.random.normal(keys[6], (N3, C3, H3, W3), dtype=jnp.float32)
    label3 = jax.random.randint(keys[7], (N3, H3, W3), 0, C3, dtype=jnp.int32)
    label3 = jnp.where(jax.random.bernoulli(keys[8], 0.2, (N3, H3, W3)),
                       IGNORE_INDEX, label3)
    wts3 = [0.5, 1.0, 1.5, 2.0, 0.25, 0.75, 1.25, 1.75]
    loss3 = jax.block_until_ready(
        cross_entropy_loss(prediction3, label3, weights=wts3, tile_pixels=256))
    ref3 = _reference_loss(prediction3, label3, weights=wts3)
    assert jnp.allclose(loss3, ref3, atol=1e-5, rtol=1e-5), (loss3, ref3)

    # Case 3b: same inputs, auto tile (single ragged 1024-lane tile).
    loss3b = jax.block_until_ready(
        cross_entropy_loss(prediction3, label3, weights=wts3))
    assert jnp.allclose(loss3b, ref3, atol=1e-5, rtol=1e-5), (loss3b, ref3)

    print("KERNEL_OK")
</pallas_src>

<mosaic_0001>
module attributes {stable_mosaic.version = 11 : i64} {
  func.func @_ce_kernel(%arg0: i32, %arg1: i32, %arg2: i32, %arg3: memref<1x4x256xf32, #tpu.memory_space<vmem>>, %arg4: memref<1x1x256xi16, #tpu.memory_space<vmem>>, %arg5: memref<1x1x8x128xf32, #tpu.memory_space<vmem>>, %arg6: memref<1x1x8x128xf32, #tpu.memory_space<vmem>>, %arg7: memref<1x256xf32, #tpu.memory_space<vmem>>, %arg8: memref<1x256xf32, #tpu.memory_space<vmem>>) attributes {dimension_semantics = [#tpu.dimension_semantics<parallel>, #tpu.dimension_semantics<parallel>, #tpu.dimension_semantics<arbitrary>], iteration_bounds = array<i64: 2, 1, 1>, scalar_prefetch = 0 : i64, scratch_operands = 2 : i64, tpu.core_type = #tpu.core_type<tc>, window_params = [{transform_indices = @transform_0, window_bounds = array<i64: 1, 4, 256>}, {transform_indices = @transform_1, window_bounds = array<i64: 1, 1, 256>}, {transform_indices = @transform_2, window_bounds = array<i64: 1, 1, 8, 128>}, {transform_indices = @transform_3, window_bounds = array<i64: 1, 1, 8, 128>}]} {
    %c0_i32 = arith.constant 0 : i32
    %0 = arith.cmpi eq, %arg2, %c0_i32 : i32
    %1 = arith.extui %0 : i1 to i32
    %c0_i32_0 = arith.constant 0 : i32
    %2 = arith.cmpi ne, %1, %c0_i32_0 : i32
    scf.if %2 {
      %cst_22 = arith.constant 0.000000e+00 : f32
      %49 = vector.broadcast %cst_22 : f32 to vector<1x256xf32>
      %c0_23 = arith.constant 0 : index
      %c0_24 = arith.constant 0 : index
      %50 = vector.load %arg7[%c0_23, %c0_24] : memref<1x256xf32, #tpu.memory_space<vmem>>, vector<1x256xf32>
      tpu.vector_store %arg7[%c0_23, %c0_24], %49 {strides = array<i32>} : memref<1x256xf32, #tpu.memory_space<vmem>>, vector<1x256xf32>,
      %cst_25 = arith.constant 0.000000e+00 : f32
      %51 = vector.broadcast %cst_25 : f32 to vector<1x256xf32>
      %c0_26 = arith.constant 0 : index
      %c0_27 = arith.constant 0 : index
      %52 = vector.load %arg8[%c0_26, %c0_27] : memref<1x256xf32, #tpu.memory_space<vmem>>, vector<1x256xf32>
      tpu.vector_store %arg8[%c0_26, %c0_27], %51 {strides = array<i32>} : memref<1x256xf32, #tpu.memory_space<vmem>>, vector<1x256xf32>,
    } else {
    }
    %c0 = arith.constant 0 : index
    %c0_1 = arith.constant 0 : index
    %c0_2 = arith.constant 0 : index
    %3 = vector.load %arg3[%c0, %c0_1, %c0_2] : memref<1x4x256xf32, #tpu.memory_space<vmem>>, vector<1x4x256xf32>
    %4 = vector.shape_cast %3 : vector<1x4x256xf32> to vector<4x256xf32>
    %c0_3 = arith.constant 0 : index
    %c0_4 = arith.constant 0 : index
    %c0_5 = arith.constant 0 : index
    %5 = vector.load %arg4[%c0_3, %c0_4, %c0_5] : memref<1x1x256xi16, #tpu.memory_space<vmem>>, vector<1x1x256xi16>
    %6 = vector.shape_cast %5 : vector<1x1x256xi16> to vector<1x256xi16>
    %7 = arith.extsi %6 : vector<1x256xi16> to vector<1x256xi32>
    %cst = arith.constant dense<0xFF800000> : vector<256xf32>
    %8 = vector.multi_reduction <maximumf>, %4, %cst [0] : vector<4x256xf32> to vector<256xf32>
    %9 = vector.shape_cast %8 : vector<256xf32> to vector<1x256xf32>
    %10 = vector.broadcast %9 : vector<1x256xf32> to vector<4x256xf32>
    %11 = arith.subf %4, %10 : vector<4x256xf32>
    %12 = math.exp %11 : vector<4x256xf32>
    %cst_6 = arith.constant dense<0.000000e+00> : vector<256xf32>
    %13 = vector.multi_reduction <add>, %12, %cst_6 [0] : vector<4x256xf32> to vector<256xf32>
    %14 = vector.shape_cast %13 : vector<256xf32> to vector<1x256xf32>
    %15 = math.log %14 : vector<1x256xf32>
    %16 = tpu.iota {dimensions = array<i32: 0>} : vector<4x256xi32>
    %17 = vector.broadcast %7 : vector<1x256xi32> to vector<4x256xi32>
    %18 = arith.cmpi eq, %16, %17 : vector<4x256xi32>
    %19 = arith.extui %18 : vector<4x256xi1> to vector<4x256xi32>
    %20 = arith.sitofp %19 : vector<4x256xi32> to vector<4x256xf32>
    %21 = arith.mulf %20, %4 : vector<4x256xf32>
    %cst_7 = arith.constant dense<0.000000e+00> : vector<256xf32>
    %22 = vector.multi_reduction <add>, %21, %cst_7 [0] : vector<4x256xf32> to vector<256xf32>
    %23 = vector.shape_cast %22 : vector<256xf32> to vector<1x256xf32>
    %24 = arith.addf %9, %15 : vector<1x256xf32>
    %25 = arith.subf %24, %23 : vector<1x256xf32>
    %c255_i32 = arith.constant 255 : i32
    %26 = vector.broadcast %c255_i32 : i32 to vector<1x256xi32>
    %27 = arith.cmpi ne, %7, %26 : vector<1x256xi32>
    %c0_i32_8 = arith.constant 0 : i32
    %28 = vector.broadcast %c0_i32_8 : i32 to vector<1x256xi32>
    %29 = arith.cmpi sge, %7, %28 : vector<1x256xi32>
    %c4_i32 = arith.constant 4 : i32
    %30 = vector.broadcast %c4_i32 : i32 to vector<1x256xi32>
    %31 = arith.cmpi slt, %7, %30 : vector<1x256xi32>
    %32 = arith.andi %29, %31 : vector<1x256xi1>
    %33 = arith.andi %27, %32 : vector<1x256xi1>
    %cst_9 = arith.constant 1.000000e+00 : f32
    %cst_10 = arith.constant 0.000000e+00 : f32
    %34 = vector.broadcast %cst_9 : f32 to vector<1x256xf32>
    %35 = vector.broadcast %cst_10 : f32 to vector<1x256xf32>
    %36 = arith.select %33, %34, %35 : vector<1x256xi1>, vector<1x256xf32>
    %c0_11 = arith.constant 0 : index
    %c0_12 = arith.constant 0 : index
    %37 = vector.load %arg7[%c0_11, %c0_12] : memref<1x256xf32, #tpu.memory_space<vmem>>, vector<1x256xf32>
    %38 = arith.mulf %36, %25 : vector<1x256xf32>
    %cst_13 = arith.constant 0.000000e+00 : f32
    %39 = vector.broadcast %cst_13 : f32 to vector<1x256xf32>
    %40 = arith.select %27, %38, %39 : vector<1x256xi1>, vector<1x256xf32>
    %41 = arith.addf %37, %40 : vector<1x256xf32>
    %c0_14 = arith.constant 0 : index
    %c0_15 = arith.constant 0 : index
    %42 = vector.load %arg7[%c0_14, %c0_15] : memref<1x256xf32, #tpu.memory_space<vmem>>, vector<1x256xf32>
    tpu.vector_store %arg7[%c0_14, %c0_15], %41 {strides = array<i32>} : memref<1x256xf32, #tpu.memory_space<vmem>>, vector<1x256xf32>,
    %c0_16 = arith.constant 0 : index
    %c0_17 = arith.constant 0 : index
    %43 = vector.load %arg8[%c0_16, %c0_17] : memref<1x256xf32, #tpu.memory_space<vmem>>, vector<1x256xf32>
    %44 = arith.addf %43, %36 : vector<1x256xf32>
    %c0_18 = arith.constant 0 : index
    %c0_19 = arith.constant 0 : index
    %45 = vector.load %arg8[%c0_18, %c0_19] : memref<1x256xf32, #tpu.memory_space<vmem>>, vector<1x256xf32>
    tpu.vector_store %arg8[%c0_18, %c0_19], %44 {strides = array<i32>} : memref<1x256xf32, #tpu.memory_space<vmem>>, vector<1x256xf32>,
    %c0_i32_20 = arith.constant 0 : i32
    %46 = arith.cmpi eq, %arg2, %c0_i32_20 : i32
    %47 = arith.extui %46 : i1 to i32
    %c0_i32_21 = arith.constant 0 : i32
    %48 = arith.cmpi ne, %47, %c0_i32_21 : i32
    scf.if %48 {
      %c0_22 = arith.constant 0 : index
      %c0_23 = arith.constant 0 : index
      %49 = vector.load %arg7[%c0_22, %c0_23] : memref<1x256xf32, #tpu.memory_space<vmem>>, vector<1x256xf32>
      %50 = vector.shape_cast %49 : vector<1x256xf32> to vector<1x1x256xf32>
      %cst_24 = arith.constant dense<0.000000e+00> : vector<1xf32>
      %51 = vector.multi_reduction <add>, %50, %cst_24 [1, 2] : vector<1x1x256xf32> to vector<1xf32>
      %52 = vector.shape_cast %51 : vector<1xf32> to vector<1x1x1xf32>
      %53 = vector.extract %52[0, 0, 0] : f32 from vector<1x1x1xf32>
      %54 = vector.broadcast %53 : f32 to vector<1x1x8x128xf32>
      %c0_25 = arith.constant 0 : index
      %c0_26 = arith.constant 0 : index
      %c0_27 = arith.constant 0 : index
      %c0_28 = arith.constant 0 : index
      %55 = vector.load %arg5[%c0_25, %c0_26, %c0_27, %c0_28] : memref<1x1x8x128xf32, #tpu.memory_space<vmem>>, vector<1x1x8x128xf32>
      tpu.vector_store %arg5[%c0_25, %c0_26, %c0_27, %c0_28], %54 {strides = array<i32>} : memref<1x1x8x128xf32, #tpu.memory_space<vmem>>, vector<1x1x8x128xf32>,
      %c0_29 = arith.constant 0 : index
      %c0_30 = arith.constant 0 : index
      %56 = vector.load %arg8[%c0_29, %c0_30] : memref<1x256xf32, #tpu.memory_space<vmem>>, vector<1x256xf32>
      %57 = vector.shape_cast %56 : vector<1x256xf32> to vector<1x1x256xf32>
      %cst_31 = arith.constant dense<0.000000e+00> : vector<1xf32>
      %58 = vector.multi_reduction <add>, %57, %cst_31 [1, 2] : vector<1x1x256xf32> to vector<1xf32>
      %59 = vector.shape_cast %58 : vector<1xf32> to vector<1x1x1xf32>
      %60 = vector.extract %59[0, 0, 0] : f32 from vector<1x1x1xf32>
      %61 = vector.broadcast %60 : f32 to vector<1x1x8x128xf32>
      %c0_32 = arith.constant 0 : index
      %c0_33 = arith.constant 0 : index
      %c0_34 = arith.constant 0 : index
      %c0_35 = arith.constant 0 : index
      %62 = vector.load %arg6[%c0_32, %c0_33, %c0_34, %c0_35] : memref<1x1x8x128xf32, #tpu.memory_space<vmem>>, vector<1x1x8x128xf32>
      tpu.vector_store %arg6[%c0_32, %c0_33, %c0_34, %c0_35], %61 {strides = array<i32>} : memref<1x1x8x128xf32, #tpu.memory_space<vmem>>, vector<1x1x8x128xf32>,
    } else {
    }
    return
  }
  func.func @transform_0(%arg0: i32, %arg1: i32, %arg2: i32) -> (i32, i32, i32) {
    %c1_i32 = arith.constant 1 : i32
    %0 = arith.muli %arg1, %c1_i32 : i32
    %1 = arith.addi %0, %arg2 : i32
    %c0_i32 = arith.constant 0 : i32
    %c0_i32_0 = arith.constant 0 : i32
    return %arg0, %c0_i32, %1 : i32, i32, i32
  }
  func.func @transform_1(%arg0: i32, %arg1: i32, %arg2: i32) -> (i32, i32, i32) {
    %c1_i32 = arith.constant 1 : i32
    %0 = arith.muli %arg1, %c1_i32 : i32
    %1 = arith.addi %0, %arg2 : i32
    %c0_i32 = arith.constant 0 : i32
    %c0_i32_0 = arith.constant 0 : i32
    return %arg0, %c0_i32, %1 : i32, i32, i32
  }
  func.func @transform_2(%arg0: i32, %arg1: i32, %arg2: i32) -> (i32, i32, i32, i32) {
    %c0_i32 = arith.constant 0 : i32
    %c0_i32_0 = arith.constant 0 : i32
    %c0_i32_1 = arith.constant 0 : i32
    return %arg0, %arg1, %c0_i32, %c0_i32_0 : i32, i32, i32, i32
  }
  func.func @transform_3(%arg0: i32, %arg1: i32, %arg2: i32) -> (i32, i32, i32, i32) {
    %c0_i32 = arith.constant 0 : i32
    %c0_i32_0 = arith.constant 0 : i32
    %c0_i32_1 = arith.constant 0 : i32
    return %arg0, %arg1, %c0_i32, %c0_i32_0 : i32, i32, i32, i32
  }
}

</mosaic_0001>

<bundles_post_ra>
// kernel: _ce_pallas.1
= control target key start
LH: loop header
LB: loop body
LE: loop exit
PB: predicated region body
PF: predicated region fallthrough
CT: control target
= control target key end

     0   :  { %9 = vsyncpa [#allocation5], 0  ;;  %s1291_s0 = inlined_call_operand.hbm [shape: f32[2,4,256], index: 0, kind: input, shape index: {}]   ;;  %s1292_s1 = inlined_call_operand.hbm [shape: s16[2,1,256], index: 1, kind: input, shape index: {}]   ;;  %s1293_s2 = inlined_call_operand.hbm [shape: f32[2,1,8,128], index: 2, kind: output, shape index: {0}]   ;;  %s1294_s3 = inlined_call_operand.hbm [shape: f32[2,1,8,128], index: 3, kind: output, shape index: {1}]  }
   0x1   :  { %11 = vsyncpa [#allocation5 + $0x1], 0 }
   0x2   :  { %12 = vsyncpa [#allocation8], 0 }
   0x3   :  { %14 = vsyncpa [#allocation8 + $0x1], 0 }
   0x4   :  { %15 = vsyncpa [#allocation6], 0 }
   0x5   :  { %17 = vsyncpa [#allocation6 + $0x1], 0 }
   0x6   :  { %18 = vsyncpa [#allocation11], 0 }
   0x7   :  { %20 = vsyncpa [#allocation11 + $0x1], 0  ;;  %s981_s12 = smov 0   ;;  %s983_s13 = smov 0  }
   0x8   :  { %s985_s14 = smov 0   ;;  %s987_s15 = smov 0  }
   0x9   :  { %s989_s16 = smov 0   ;;  %s991_s17 = smov 0  }
   0xa LB: > { %s663_s18 = sadd.s32 4294967295, %s952_s17   ;;  %s664_s19 = sadd.s32 4294967294, %s952_s17   ;;  %s952_s17 = sphi %s991_s17, %s26_s17   ;;  %s948_s16 = sphi %s989_s16, %s1316_s16   ;;  %s944_s15 = sphi %s987_s15, %s1315_s15   ;;  %s940_s14 = sphi %s985_s14, %s1314_s14   ;;  %s936_s13 = sphi %s983_s13, %s1313_s13   ;;  %s932_s12 = sphi %s981_s12, %s1312_s12  }
   0xb   : > { %s45_s20 = sadd.s32 1, %s948_s16  ;;  %s56_s21 = sadd.s32 1, %s940_s14 }
   0xc   : > { %p47_p0 = scmp.ge.s32.totalorder %s45_s20, 2  ;;  %p63_p1 = scmp.ne.s32.totalorder %s940_s14, %s936_s13 }
   0xd   : > { %p64_p2 = scmp.eq.s32.totalorder %s952_s17, 0  ;;  %p69_p3 = scmp.ne.s32.totalorder %s936_s13, %s932_s12 }
   0xe   : > { %s1318_s20 = smov (%p47_p0, %s45_s20), 0  ;;  %p70_p5 = scmp.eq.s32.totalorder %s663_s18, 0 }
   0xf   : > { %p1022_p4 = por %p64_p2, %p63_p1  ;;  %s51_s23 = ssub.s32 %s948_s16, %s1318_s20 }
  0x10   : > { %p125_p6 = scmp.eq.s32.totalorder %s663_s18, 1  ;;  %p54_p7 = scmp.eq.s32.totalorder %s51_s23, 0 }
  0x11   : > { %p1028_p8 = por %p70_p5, %p69_p3  ;;  %p131_p10 = scmp.eq.s32.totalorder %s664_s19, 1 }
  0x12   : > { %p1032_p9 = por %p125_p6, %p63_p1  ;;  %p714_p13 = scmp.lt.s32.totalorder %s952_s17, 2 }
  0x13   : > { %s1298_s24 = scalar_select %p1028_p8, 1, 0 }
  0x14   : > { %s1299_s25 = scalar_select %p1032_p9, 1, 0 }
  0x15   : > { %s1037_s26 = scalar_select %p54_p7, %s940_s14, %s56_s21  }
  0x16   : > { %p1039_p11 = por %p131_p10, %p69_p3  ;;  %s1046_s28 = sand.u32 1, %s940_s14  }
  0x17   : > { %s667_s29 = sshll.u32 %s1046_s28, 3  ;;  %s686_s30 = sshll.u32 %s948_s16, 7 }
  0x18   : > { %s1300_s27 = scalar_select %p1039_p11, 1, 0 }
  0x19   : > { %s1053_s6 = scalar_lea.hbm %s1291_s0, %s686_s30  ;;  %s183_s7 = scalar_lea.vmem [#allocation4], %s667_s29 }
  0x1a   : > { %s194_s8 = sshll.u32 %s183_s7, 4  ;;  %p1059_p0 = pnand %p714_p13, %p1022_p4  ;;  %s1055_s8 = int_to_ptr.vmem [resolvable:$true] %s194_s8 }
  0x1b   : > { %s180_s10 = scalar_lea.sflag [#allocation5], %s1046_s28  ;;  %s774_s11 = scalar_lea.hbm %s1053_s6, 128 }
  0x1c   : > { %p775_p3 = scmp.ne.s32.totalorder %s1053_s6, %s774_s11  ;;  %p776_p5 = pneg %p1059_p0 }
  0x1d   : > { %s779_s21 = scalar_lea.hbm %s1291_s0, 256  ;;  %p780_p4 = scmp.lt.u32.totalorder %s1053_s6, %s1291_s0 }
  0x1e   : > { %p777_p6 = pnand %p776_p5, %p775_p3  ;;  %p781_p10 = scmp.lt.u32.totalorder %s779_s21, %s774_s11 }
  0x1f   : > { %p783_p12 = scmp.lt.u32.totalorder %s774_s11, %s1053_s6 }
  0x20   : > { %p778_p7 = pneg %p777_p6  ;;  %p782_p13 = por %p781_p10, %p780_p4 }
  0x22   : > { %p784_p1 = por %p783_p12, %p782_p13 }
  0x24   : > { %p785_p2 = pnand %p784_p1, %p778_p7 }
  0x26   : > { %788 = shalt.err (!%p785_p2)
}
  0x27   : > { %s789_s29 = scalar_lea.vmem %s1055_s8, 128  ;;  %s954_s30 = smov [#allocation4]  }
  0x28   : > { %p790_p3 = scmp.ne.s32.totalorder %s1055_s8, %s789_s29  ;;  %s794_s4 = sshll.u32 %s954_s30, 4  ;;  %s795_s4 = int_to_ptr.vmem [resolvable:$false] %s794_s4 }
  0x29   : > { %s796_s5 = scalar_lea.vmem %s795_s4, 256  ;;  %p797_p9 = scmp.lt.s32.totalorder %s1055_s8, %s795_s4 }
  0x2a   : > { %p792_p6 = pnand %p790_p3, %p776_p5  ;;  %p798_p4 = scmp.lt.s32.totalorder %s796_s5, %s789_s29 }
  0x2c   : > { %p793_p11 = pneg %p792_p6  ;;  %p799_p10 = por %p798_p4, %p797_p9 }
  0x2e   : > { %p800_p12 = pnand %p799_p10, %p793_p11 }
  0x30   : > { %803 = shalt.err (!%p800_p12)
}
  0x31   : > { %703 = dma.hbm_to_vmem [thread:$0]  (!%p1059_p0), %s1053_s6, 128, %s1055_s8, %s180_s10  }
  0x32   : > { %p1302_p1 = scmp.lt.s32.totalorder %s952_s17, 3  ;;  %p1303_p2 = scmp.ge.s32.totalorder %s952_s17, 1 }
  0x33   : > { %s670_s11 = sshll.u32 %s1046_s28, 1  ;;  %s687_s18 = sshll.u32 %s948_s16, 5 }
  0x34   : > { %p1095_p7 = pnand %p1303_p2, %p1302_p1  ;;  %s1104_s22 = scalar_lea.hbm %s1292_s1, %s687_s18 }
  0x35   : > { %s205_s23 = scalar_lea.vmem [#allocation7], %s670_s11  ;;  %s202_s6 = scalar_lea.sflag [#allocation8], %s1046_s28 }
  0x36   : > { %s1304_s7 = scalar_select %p1095_p7, 1, 0 }
  0x37   : > { %s216_s29 = sshll.u32 %s205_s23, 4  ;;  %s804_s8 = scalar_lea.hbm %s1104_s22, 32  ;;  %s217_s29 = int_to_ptr.vmem [resolvable:$true] %s216_s29 }
  0x38   : > { %p805_p9 = scmp.ne.s32.totalorder %s1104_s22, %s804_s8  ;;  %s809_s4 = scalar_lea.hbm %s1292_s1, 64 }
  0x39   : > { %p810_p3 = scmp.lt.u32.totalorder %s1104_s22, %s1292_s1  ;;  %p811_p6 = scmp.lt.u32.totalorder %s809_s4, %s804_s8 }
  0x3a   : > { %p807_p11 = pnand %p805_p9, %p776_p5  ;;  %p813_p10 = scmp.lt.u32.totalorder %s804_s8, %s1104_s22 }
  0x3b   : > { %p812_p4 = por %p811_p6, %p810_p3 }
  0x3c   : > { %p808_p13 = pneg %p807_p11 }
  0x3d   : > { %p814_p12 = por %p813_p10, %p812_p4 }
  0x3f   : > { %p815_p1 = pnand %p814_p12, %p808_p13 }
  0x41   : > { %818 = shalt.err (!%p815_p1)
}
  0x42   : > { %s819_s28 = scalar_lea.vmem %s217_s29, 32  ;;  %s955_s11 = smov [#allocation7]  }
  0x43   : > { %p820_p2 = scmp.ne.s32.totalorder %s217_s29, %s819_s28  ;;  %s824_s19 = sshll.u32 %s955_s11, 4  ;;  %s825_s19 = int_to_ptr.vmem [resolvable:$false] %s824_s19 }
  0x44   : > { %s826_s21 = scalar_lea.vmem %s825_s19, 64  ;;  %p827_p8 = scmp.lt.s32.totalorder %s217_s29, %s825_s19 }
  0x45   : > { %p822_p9 = pnand %p820_p2, %p776_p5  ;;  %p828_p7 = scmp.lt.s32.totalorder %s826_s21, %s819_s28 }
  0x47   : > { %p823_p11 = pneg %p822_p9  ;;  %p829_p3 = por %p828_p7, %p827_p8 }
  0x49   : > { %p830_p6 = pnand %p829_p3, %p823_p11 }
  0x4b   : > { %833 = shalt.err (!%p830_p6)
}
  0x4c   : > { %706 = dma.hbm_to_vmem [thread:$0]  (!%p1059_p0), %s1104_s22, 32, %s217_s29, %s202_s6  }
  0x4d   : > { %p1305_p13 = scmp.ne.s32.totalorder %s1304_s7, 0 }
  0x4e   : > { %s1129_s23 = sand.u32 (!%p1305_p13), 1, %s936_s13   ;;  %p1306_p8 = scmp.ne.s32.totalorder (!%p1305_p13), %s1298_s24, 0 }
  0x4f   : > { %225 = sbr.rel (%p1305_p13) target bundleno = 422 (0x1a6), region = 28  ;;  %s1132_s8 = sshll.u32 (!%p1305_p13), %s1129_s23, 3 }
  0x50   : > { %s228_s10 = scalar_lea.sflag (!%p1305_p13), [#allocation5], %s1129_s23  ;;  %s231_s30 = scalar_lea.vmem (!%p1305_p13), [#allocation4], %s1132_s8 }
  0x56   : > { %915 = dma.done.wait (%p1306_p8), %s228_s10, 128  }
  0x57   : > { %917 = vsyncadd (%p1306_p8), %s228_s10, 4294967168  ;;  %s675_s9 = sshll.u32 %s1129_s23, 1  ;;  %s237_s7 = scalar_lea.sflag [#allocation8], %s1129_s23 }
  0x58   : > { %s240_s22 = scalar_lea.vmem [#allocation7], %s675_s9 }
  0x59   : > { %919 = dma.done.wait (%p1306_p8), %s237_s7, 32  }
  0x5a   : > { %921 = vsyncadd (%p1306_p8), %s237_s7, 4294967264  ;;  %v281_v0 = vlaneseq  ;;  %v956_v2 = vmov 0.0   ;;  %vm293_vm1 = vcmask 1043456   ;;  %v957_v3 = vmov 1966171168   ;;  %v287_v5 = vld [vmem:[%s231_s30] sm:$0xff] }
  0x5b   : > { %v402_v4 = vunpack.c.l.s4 %v957_v3  ;;  %v288_v6 = vld [vmem:[%s240_s22] sm:$0x3]  ;;  %v291_v8 = vcombine.high %v287_v5, %v287_v5  ;;  %v294_v9 = vsel %vm293_vm1, %v287_v5, -inf  ;;  %vm442_vm9 = vcmask 1040384   ;;  %s682_s24 = sshll.u32 %s944_s15, 7  ;;  %s265_s29 = scalar_lea.vmem [#allocation9], %s1132_s8 }
  0x5c   : > { %vm1146_vm0 = vcmp.lt.s32.totalorder %v281_v0, 256  ;;  %v1154_v7 = vunpack.c.l.b16 %v288_v6  ;;  %v295_v10 = vrot.slane %v294_v9, 4  ;;  %v1161_v15 = vshrl.u32 %v281_v0, 7  ;;  %s503_s6 = sshll.u32 %s265_s29, 4  ;;  %s272_s4 = scalar_lea.vmem [#allocation10], %s1132_s8  ;;  %s1211_s6 = int_to_ptr.vmem [resolvable:$true] %s503_s6 }
  0x5d   : > { %285 = vst.msk [vmem:[#allocation2] sm:$0x3] %vm1146_vm0, %v956_v2  ;;  %286 = vst.msk [vmem:[#allocation3] sm:$0x3] %vm1146_vm0, %v956_v2  ;;  %v301_v11 = vsel %vm293_vm1, %v291_v8, -inf  ;;  %v403_v12 = vunpack.c.0.s8 %v402_v4  ;;  %s517_s5 = sshll.u32 %s272_s4, 4  ;;  %s1209_s11 = scalar_lea.hbm %s1293_s2, %s682_s24  ;;  %s1213_s5 = int_to_ptr.vmem [resolvable:$true] %s517_s5 }
  0x5e   : > { %vm380_vm2 = vcmp.ne.s32.totalorder %v1154_v7, 255  ;;  %v296_v13 = vmax.f32 %v294_v9, %v295_v10  ;;  %v302_v14 = vrot.slane %v301_v11, 4  ;;  %vm381_vm3 = vcmp.ge.s32.totalorder %v1154_v7, 0  ;;  %s484_s21 = scalar_lea.sflag [#allocation6], %s1129_s23  ;;  %s834_s10 = scalar_lea.vmem %s1211_s6, 128 }
  0x5f   : > { %vm382_vm4 = vcmp.lt.s32.totalorder %v1154_v7, 4  ;;  %v1166_v18 = vsub.s32 %v403_v12, %v1161_v15  ;;  %v1173_v29 = vsub.s32 0, %v1161_v15  ;;  %v344_v31 = vsub.s32 2, %v1161_v15  ;;  %p835_p0 = scmp.ne.s32.totalorder %s1211_s6, %s834_s10  ;;  %p1309_p5 = scmp.ne.s32.totalorder %s1299_s25, 0 }
  0x60   : > { %vm383_vm5 = vmand %vm381_vm3, %vm382_vm4  ;;  %v297_v16 = vrot.slane %v296_v13, 2  ;;  %v303_v17 = vmax.f32 %v301_v11, %v302_v14  ;;  %v958_v9 = vmov 1983009808   ;;  %s959_s30 = smov [#allocation9]  }
  0x61   : > { %vm384_vm6 = vmand %vm380_vm2, %vm383_vm5  ;;  %v341_v33 = vrot.slane %v1154_v7, %v1173_v29  ;;  %v345_v35 = vrot.slane %v1154_v7, %v344_v31  ;;  %v391_v10 = vunpack.c.l.s4 %v958_v9  ;;  %p836_p7 = pnand %p835_p0, %p1309_p5  ;;  %s838_s9 = sshll.u32 %s959_s30, 4  ;;  %s839_s9 = int_to_ptr.vmem [resolvable:$false] %s838_s9 }
  0x62   : > { %v298_v19 = vmax.f32 %v296_v13, %v297_v16  ;;  %v304_v20 = vrot.slane %v303_v17, 2  ;;  %v1168_v21 = vsel %vm384_vm6, 1.0, %v956_v2  ;;  %s840_s7 = scalar_lea.vmem %s839_s9, 256  ;;  %p841_p10 = scmp.lt.s32.totalorder %s1211_s6, %s839_s9 }
  0x63   : > { %v423_v23 = vrot.slane %v1168_v21, %v1166_v18  ;;  %v349_v37 = vrot.slane %v341_v33, %v1173_v29  ;;  %v353_v38 = vrot.slane %v345_v35, %v1173_v29  ;;  %p837_p4 = pneg %p836_p7  ;;  %p842_p12 = scmp.lt.s32.totalorder %s840_s7, %s834_s10 }
  0x64   : > { %v415_v22 = vld [vmem:[#allocation3] sm:$0x3]  ;;  %v299_v24 = vrot.slane %v298_v19, 1  ;;  %v305_v25 = vmax.f32 %v303_v17, %v304_v20  ;;  %v392_v20 = vunpack.c.0.s8 %v391_v10 }
  0x65   : > { %v425_v26 = vadd.f32 %v423_v23, %v415_v22  ;;  %vm354_vm7 = vcmp.eq.s32.totalorder %v1161_v15, %v349_v37  ;;  %vm355_vm8 = vcmp.eq.s32.totalorder %v1161_v15, %v353_v38  ;;  %p843_p1 = por %p842_p12, %p841_p10 }
  0x66   : > { %v300_v27 = vmax.f32 %v298_v19, %v299_v24  ;;  %v306_v28 = vrot.slane %v305_v25, 1  ;;  %v678_v39 = vsel %vm354_vm7, 1.0, %v956_v2  ;;  %v679_v40 = vsel %vm355_vm8, 1.0, %v956_v2 }
  0x67   : > { %426 = vst.msk [vmem:[#allocation3] sm:$0x3] %vm1146_vm0, %v425_v26  ;;  %v360_v41 = vmul.f32 %v678_v39, %v287_v5  ;;  %v361_v43 = vmul.f32 %v679_v40, %v291_v8  ;;  %p844_p2 = pnand %p843_p1, %p837_p4 }
  0x68   : > { %v307_v30 = vmax.f32 %v305_v25, %v306_v28  ;;  %v395_v25 = vsub.s32 %v392_v20, %v1161_v15 }
  0x69   : > { %v362_v47 = vsel %vm293_vm1, %v360_v41, 0.0  ;;  %v369_v51 = vsel %vm293_vm1, %v361_v43, 0.0 }
  0x6a   : > { %v310_v32 = vcombine.low %v300_v27, %v307_v30  ;;  %v363_v52 = vrot.slane %v362_v47, 4  ;;  %v370_v55 = vrot.slane %v369_v51, 4 }
  0x6c   : > { %v312_v34 = vsub.f32 %v287_v5, %v310_v32  ;;  %v364_v58 = vadd.f32 %v363_v52, %v362_v47  ;;  %v371_v61 = vadd.f32 %v370_v55, %v369_v51  ;;  %v386_v32 = vld [vmem:[#allocation2] sm:$0x3] }
  0x6e   : > { %v313_v36 = vmul.f32 1.442695, %v312_v34  ;;  %v365_v0 = vrot.slane %v364_v58, 2  ;;  %v372_v3 = vrot.slane %v371_v61, 2 }
  0x70   : > { %768 = vpow2.f32 %v313_v36  ;;  %v366_v4 = vadd.f32 %v365_v0, %v364_v58  ;;  %v373_v5 = vadd.f32 %v372_v3, %v371_v61 }
  0x72   : > { %v367_v6 = vrot.slane %v366_v4, 1  ;;  %v374_v8 = vrot.slane %v373_v5, 1 }
  0x74   : > { %v368_v13 = vadd.f32 %v367_v6, %v366_v4  ;;  %v375_v17 = vadd.f32 %v374_v8, %v373_v5 }
  0x7a   : > { %v769_v42 = vpop.eup %768 }
  0x7b   : > { %v316_v44 = vcombine.high %v769_v42, %v769_v42  ;;  %v318_v45 = vsel %vm293_vm1, %v769_v42, 0.0 }
  0x7c   : > { %v319_v46 = vrot.slane %v318_v45, 4 }
  0x7d   : > { %v325_v48 = vsel %vm293_vm1, %v316_v44, 0.0 }
  0x7e   : > { %v320_v49 = vadd.f32 %v319_v46, %v318_v45  ;;  %v326_v50 = vrot.slane %v325_v48, 4 }
  0x80   : > { %v321_v53 = vrot.slane %v320_v49, 2  ;;  %v327_v54 = vadd.f32 %v326_v50, %v325_v48 }
  0x82   : > { %v322_v56 = vadd.f32 %v321_v53, %v320_v49  ;;  %v328_v57 = vrot.slane %v327_v54, 2 }
  0x84   : > { %v323_v59 = vrot.slane %v322_v56, 1  ;;  %v329_v60 = vadd.f32 %v328_v57, %v327_v54 }
  0x86   : > { %v324_v62 = vadd.f32 %v323_v59, %v322_v56  ;;  %v330_v63 = vrot.slane %v329_v60, 1 }
  0x88   : > { %v331_v2 = vadd.f32 %v330_v63, %v329_v60  ;;  %770 = vlog2.f32 %v324_v62 }
  0x8a   : > { %772 = vlog2.f32 %v331_v2 }
  0x92   : > { %v771_v11 = vpop.eup %770 }
  0x93   : > { %v333_v12 = vmul.f32 0.6931472, %v771_v11 }
  0x94   : > { %v773_v14 = vpop.eup %772 }
  0x95   : > { %v335_v16 = vmul.f32 0.6931472, %v773_v14  ;;  %v376_v19 = vadd.f32 %v333_v12, %v300_v27  ;;  %v457_v27 = vld [vmem:[#allocation3] sm:$0x3] }
  0x96   : > { %v462_v36 = vrot.slane %v457_v27, %v1173_v29 }
  0x97   : > { %v377_v22 = vadd.f32 %v335_v16, %v307_v30  ;;  %v378_v23 = vsub.f32 %v376_v19, %v368_v13  ;;  %v438_v30 = vsub.s32 1, %v1161_v15 }
  0x98   : > { %v469_v41 = vsel %vm442_vm9, %v462_v36, 0.0 }
  0x99   : > { %v379_v24 = vsub.f32 %v377_v22, %v375_v17  ;;  %v466_v37 = vrot.slane %v457_v27, %v438_v30 }
  0x9b   : > { %v389_v26 = vcombine.low %v378_v23, %v379_v24  ;;  %v470_v42 = vsel %vm442_vm9, %v466_v37, 0.0 }
  0x9c   : > { %v471_v43 = vadd.f32 %v470_v42, %v469_v41 }
  0x9d   : > { %v396_v28 = vrot.slane %v389_v26, %v395_v25 }
  0x9f   : > { %v398_v31 = vmul.f32 %v396_v28, %v1168_v21 }
  0xa1   : > { %v399_v33 = vsel %vm380_vm2, %v398_v31, 0.0 }
  0xa2   : > { %v407_v34 = vrot.slane %v399_v33, %v1166_v18 }
  0xa4   : > { %v409_v35 = vadd.f32 %v407_v34, %v386_v32 }
  0xa6   : > { %414 = vst.msk [vmem:[#allocation2] sm:$0x3] %vm1146_vm0, %v409_v35 }
  0xad   : > { %v430_v38 = vld [vmem:[#allocation2] sm:$0x3] }
  0xae   : > { %v435_v21 = vrot.slane %v430_v38, %v1173_v29  ;;  %v439_v39 = vrot.slane %v430_v38, %v438_v30 }
  0xb0   : > { %v443_v40 = vsel %vm442_vm9, %v435_v21, 0.0  ;;  %v444_v7 = vsel %vm442_vm9, %v439_v39, 0.0 }
  0xb1   : > { %v445_v18 = vadd.f32 %v444_v7, %v443_v40 }
  0xb3   : > { %446 = vadd.xlane.f32.xlu0 %v445_v18 }
  0xb7   : > { %472 = vadd.xlane.f32.xlu0 %v471_v43 }
 0x140   : > { %v447_v1 = vpop.xlane.xlu0 %446 }
 0x141   : > { %v448_v44 = vrot.slane %v447_v1, 4 }
 0x143   : > { %v449_v15 = vadd.f32 %v448_v44, %v447_v1 }
 0x144   : > { %v473_v45 = vpop.xlane.xlu0 %472 }
 0x145   : > { %v450_v46 = vrot.slane %v449_v15, 2  ;;  %v474_v47 = vrot.slane %v473_v45, 4 }
 0x147   : > { %v475_v29 = vadd.f32 %v474_v47, %v473_v45  ;;  %v451_v48 = vadd.f32 %v450_v46, %v449_v15 }
 0x149   : > { %v476_v49 = vrot.slane %v475_v29, 2  ;;  %v452_v50 = vrot.slane %v451_v48, 1 }
 0x14b   : > { %v477_v51 = vadd.f32 %v476_v49, %v475_v29  ;;  %v453_v52 = vadd.f32 %v452_v50, %v451_v48 }
 0x14d   : > { %688 = vpush %v453_v52  ;;  %v478_v53 = vrot.slane %v477_v51, 1 }
 0x14f   : > { %v479_v54 = vadd.f32 %v478_v53, %v477_v51 }
 0x151   : > { %690 = vpush %v479_v54 }
 0x17e   : > { %s689_s19 = spop %688 }
 0x17f   : > { %v455_v55 = vstv %s689_s19 }
 0x180   : > { %456 = vst [vmem:[%s265_s29] sm:$0xff] %v455_v55 }
 0x181   : > { %847 = shalt.err (!%p844_p2)
}
 0x182   : > { %s848_s22 = scalar_lea.hbm %s1209_s11, 128  ;;  %s852_s28 = scalar_lea.hbm %s1293_s2, 256 }
 0x183   : > { %p849_p9 = scmp.ne.s32.totalorder %s1209_s11, %s848_s22  ;;  %p853_p6 = scmp.lt.u32.totalorder %s1209_s11, %s1293_s2 }
 0x184   : > { %p854_p13 = scmp.lt.u32.totalorder %s852_s28, %s848_s22  ;;  %p856_p0 = scmp.lt.u32.totalorder %s848_s22, %s1209_s11 }
 0x185   : > { %p850_p11 = pnand %p849_p9, %p1309_p5 }
 0x186   : > { %p855_p8 = por %p854_p13, %p853_p6 }
 0x187   : > { %p851_p3 = pneg %p850_p11 }
 0x188   : > { %p857_p7 = por %p856_p0, %p855_p8 }
 0x18a   : > { %p858_p4 = pnand %p857_p7, %p851_p3 }
 0x18c   : > { %861 = shalt.err (!%p858_p4)
}
 0x18d   : > { %696 = dma.vmem_to_hbm [thread:$0]  (%p1309_p5), %s1211_s6, 128, %s1209_s11, %s484_s21  }
 0x18e   : > { %s691_s10 = spop %690  ;;  %s1242_s22 = scalar_lea.hbm %s1294_s3, %s682_s24 }
 0x18f   : > { %v481_v56 = vstv %s691_s10  ;;  %s489_s29 = scalar_lea.sflag [#allocation11], %s1129_s23  ;;  %s862_s18 = scalar_lea.vmem %s1213_s5, 128 }
 0x190   : > { %482 = vst [vmem:[%s272_s4] sm:$0xff] %v481_v56  ;;  %p863_p10 = scmp.ne.s32.totalorder %s1213_s5, %s862_s18  ;;  %s960_s28 = smov [#allocation10]  }
 0x191   : > { %s866_s19 = sshll.u32 %s960_s28, 4  ;;  %s867_s19 = int_to_ptr.vmem [resolvable:$false] %s866_s19 }
 0x192   : > { %p864_p12 = pnand %p863_p10, %p1309_p5  ;;  %s868_s6 = scalar_lea.vmem %s867_s19, 256 }
 0x193   : > { %p869_p2 = scmp.lt.s32.totalorder %s1213_s5, %s867_s19  ;;  %p870_p9 = scmp.lt.s32.totalorder %s868_s6, %s862_s18 }
 0x194   : > { %p865_p1 = pneg %p864_p12 }
 0x195   : > { %p871_p11 = por %p870_p9, %p869_p2 }
 0x197   : > { %p872_p3 = pnand %p871_p11, %p865_p1 }
 0x199   : > { %875 = shalt.err (!%p872_p3)
}
 0x19a   : > { %s876_s15 = scalar_lea.hbm %s1242_s22, 128  ;;  %s880_s24 = scalar_lea.hbm %s1294_s3, 256 }
 0x19b   : > { %p877_p6 = scmp.ne.s32.totalorder %s1242_s22, %s876_s15  ;;  %p881_p0 = scmp.lt.u32.totalorder %s1242_s22, %s1294_s3 }
 0x19c   : > { %p882_p7 = scmp.lt.u32.totalorder %s880_s24, %s876_s15  ;;  %p884_p10 = scmp.lt.u32.totalorder %s876_s15, %s1242_s22 }
 0x19d   : > { %p878_p13 = pnand %p877_p6, %p1309_p5 }
 0x19e   : > { %p883_p4 = por %p882_p7, %p881_p0 }
 0x19f   : > { %p879_p8 = pneg %p878_p13 }
 0x1a0   : > { %p885_p12 = por %p884_p10, %p883_p4 }
 0x1a2   : > { %p886_p1 = pnand %p885_p12, %p879_p8 }
 0x1a4   : > { %889 = shalt.err (!%p886_p1)
}
 0x1a5   : > { %697 = dma.vmem_to_hbm [thread:$0]  (%p1309_p5), %s1213_s5, 128, %s1242_s22, %s489_s29  }
 0x1a6 PF: > { %s529_s21 = sand.u32 1, %s932_s12   ;;  %p1310_p2 = scmp.ne.s32.totalorder %s1300_s27, 0 }
 0x1a7   : > { %p1311_p9 = scmp.ge.s32.totalorder %s952_s17, 2  ;;  %s530_s30 = scalar_lea.sflag [#allocation6], %s529_s21 }
 0x1a9   : > { %p708_p11 = pnand %p1311_p9, %p1310_p2 }
 0x1ab   : > { %923 = dma.done.wait (!%p708_p11), %s530_s30, 128  }
 0x1ac   : > { %925 = vsyncadd (!%p708_p11), %s530_s30, 4294967168  ;;  %s539_s10 = scalar_lea.sflag [#allocation11], %s529_s21 }
 0x1ad   : > { %927 = dma.done.wait (!%p708_p11), %s539_s10, 128  }
 0x1ae   : > { %929 = vsyncadd (!%p708_p11), %s539_s10, 4294967168  ;;  %s26_s17 = sadd.s32 1, %s952_s17   ;;  %s1312_s12 = smov %s936_s13 }
 0x1af   : > { %p23_p3 = scmp.ge.s32.totalorder %s26_s17, 4   ;;  %s1313_s13 = smov %s940_s14 }
 0x1b0   : > { %s1314_s14 = smov %s1037_s26  ;;  %s1315_s15 = smov %s948_s16 }
 0x1b1   : > { %s1316_s16 = smov %s1318_s20  ;;  %25 = sbr.rel (!%p23_p3) target bundleno = 10 (0xa), region = 111 }
 0x1b8   :  { %544 = vsyncpa [#allocation5], 1 }
 0x1b9   :  { %546 = vsyncpa [#allocation5 + $0x1], 1 }
 0x1ba   :  { %547 = vsyncpa [#allocation8], 1 }
 0x1bb   :  { %549 = vsyncpa [#allocation8 + $0x1], 1 }
 0x1bc   :  { %550 = vsyncpa [#allocation6], 1 }
 0x1bd   :  { %552 = vsyncpa [#allocation6 + $0x1], 1 }
 0x1be   :  { %553 = vsyncpa [#allocation11], 1 }
 0x1bf   :  { %555 = vsyncpa [#allocation11 + $0x1], 1 }

</bundles_post_ra>
